<compile_context>
chip_gen: v5e
topology: v5e:2x2
jax: 0.10.0
libtpu: 0.0.40
codegen_flags: <defaults>
</compile_context>

<pallas_src>
import functools

import jax
import jax.numpy as jnp
from jax.experimental import pallas as pl
from jax.experimental.pallas import tpu as pltpu


def _round_up(x, m):
    return (x + m - 1) // m * m


def _vmem_limit_bytes():
    # Per-generation scoped-VMEM limit: ~3/4 of physical capacity
    # (v5e/v6e: 128 MiB -> 96 MiB, v7x: 64 MiB -> 48 MiB).  Conservative
    # 32 MiB fallback if the query is unavailable.
    try:
        cap = int(pltpu.get_tpu_info().vmem_capacity_bytes)
        return max(32 * 1024 * 1024, (cap * 3) // 4)
    except Exception:
        return 32 * 1024 * 1024


_VMEM_LIMIT = _vmem_limit_bytes()


# ----------------------------------------------------------------------------
# Kernel 1: tiled matmul + bias (folded BN) + optional ReLU
# ----------------------------------------------------------------------------
def _mm_bias_single_kernel(apply_relu, x_ref, w_ref, b_ref, o_ref):
    # Single K-step: accumulate locally, write the output tile exactly once.
    y = jnp.dot(x_ref[...], w_ref[...], preferred_element_type=jnp.float32)
    y = y + b_ref[...]
    if apply_relu:
        y = jnp.maximum(y, 0.0)
    o_ref[...] = y.astype(o_ref.dtype)


def _mm_bias_kernel(apply_relu, x_ref, w_ref, b_ref, o_ref, acc_ref):
    # Multi K-step: f32 accumulator persists across the reduction axis.
    k = pl.program_id(2)

    @pl.when(k == 0)
    def _():
        acc_ref[...] = jnp.zeros_like(acc_ref)

    acc_ref[...] += jnp.dot(x_ref[...], w_ref[...],
                            preferred_element_type=jnp.float32)

    @pl.when(k == pl.num_programs(2) - 1)
    def _():
        y = acc_ref[...] + b_ref[...]
        if apply_relu:
            y = jnp.maximum(y, 0.0)
        o_ref[...] = y.astype(o_ref.dtype)


def matmul_bias(x, w, shift, relu=True, out_dtype=jnp.bfloat16):
    """y = relu?((x @ w) + shift); bf16 operands, f32 accumulation."""
    M, K = x.shape
    K2, Nc = w.shape
    assert K == K2
    # Adaptive tiles: full-dim blocks (legal even when unaligned) avoid any
    # activation/weight padding at in-network shapes; large dims use 1024/512
    # blocks (well inside the per-generation VMEM limit).
    if M <= 1024:
        TM = Mp = _round_up(M, 16)            # 16: bf16 packs 16 sublanes/vreg
    else:
        TM, Mp = 1024, _round_up(M, 1024)
    if K <= 2048:
        TK = Kp = K
    else:
        TK, Kp = 512, _round_up(K, 512)
    if Nc < 128:
        TN = Np = 128                         # lane-dense output stores
    elif Nc <= 1024:
        TN = Np = Nc
    else:
        TN, Np = 512, _round_up(Nc, 512)

    xb = x.astype(jnp.bfloat16)
    wb = w.astype(jnp.bfloat16)
    if (Mp, Kp) != (M, K):
        xb = jnp.pad(xb, ((0, Mp - M), (0, Kp - K)))
    if (Kp, Np) != (K, Nc):
        wb = jnp.pad(wb, ((0, Kp - K), (0, Np - Nc)))
    b = shift.astype(jnp.float32).reshape(1, -1)
    if Np != Nc:
        b = jnp.pad(b, ((0, 0), (0, Np - Nc)))

    nk = Kp // TK
    if nk == 1:
        out = pl.pallas_call(
            functools.partial(_mm_bias_single_kernel, relu),
            out_shape=jax.ShapeDtypeStruct((Mp, Np), out_dtype),
            grid_spec=pltpu.PrefetchScalarGridSpec(
                num_scalar_prefetch=0,
                grid=(Mp // TM, Np // TN),
                in_specs=[
                    pl.BlockSpec((TM, TK), lambda i, j: (i, 0)),
                    pl.BlockSpec((TK, TN), lambda i, j: (0, j)),
                    pl.BlockSpec((1, TN), lambda i, j: (0, j)),
                ],
                out_specs=pl.BlockSpec((TM, TN), lambda i, j: (i, j)),
            ),
            compiler_params=pltpu.CompilerParams(
                dimension_semantics=("parallel", "parallel"),
                vmem_limit_bytes=_VMEM_LIMIT),
        )(xb, wb, b)
    else:
        out = pl.pallas_call(
            functools.partial(_mm_bias_kernel, relu),
            out_shape=jax.ShapeDtypeStruct((Mp, Np), out_dtype),
            grid_spec=pltpu.PrefetchScalarGridSpec(
                num_scalar_prefetch=0,
                grid=(Mp // TM, Np // TN, nk),
                in_specs=[
                    pl.BlockSpec((TM, TK), lambda i, j, k: (i, k)),
                    pl.BlockSpec((TK, TN), lambda i, j, k: (k, j)),
                    pl.BlockSpec((1, TN), lambda i, j, k: (0, j)),
                ],
                out_specs=pl.BlockSpec((TM, TN), lambda i, j, k: (i, j)),
                scratch_shapes=[pltpu.VMEM((TM, TN), jnp.float32)],
            ),
            compiler_params=pltpu.CompilerParams(
                dimension_semantics=("parallel", "parallel", "arbitrary"),
                vmem_limit_bytes=_VMEM_LIMIT),
        )(xb, wb, b)
    if (Mp, Np) != (M, Nc):
        out = out[:M, :Nc]
    return out


# ----------------------------------------------------------------------------
# Kernel 2: fused "same" 3x3 conv (stride 1, padding == dilation) + BN + ReLU
# ----------------------------------------------------------------------------
def _conv3x3_kernel(tap_offsets, deep, apply_relu, x_ref, w_ref, b_ref, o_ref):
    # x_ref: (Rc, Cin)   flattened, spatially padded row-chunk (incl. halo)
    # w_ref: (T, Cin, Cout) per-tap path | (T*Cin, Cout) deep path
    # b_ref: (1, Cout);  o_ref: (TMo, Cout)
    mo = o_ref.shape[0]
    if deep:
        # Small Cin: concatenate the T tap windows along K and run one deep
        # matmul (a near-full MXU pass instead of T shallow ones).
        xcat = jnp.concatenate(
            [x_ref[pl.ds(off, mo), :] for off in tap_offsets], axis=-1)
        acc = jnp.dot(xcat, w_ref[...], preferred_element_type=jnp.float32)
    else:
        acc = jnp.dot(x_ref[pl.ds(tap_offsets[0], mo), :], w_ref[0],
                      preferred_element_type=jnp.float32)
        for t in range(1, len(tap_offsets)):
            acc = acc + jnp.dot(x_ref[pl.ds(tap_offsets[t], mo), :], w_ref[t],
                                preferred_element_type=jnp.float32)
    y = acc + b_ref[...]
    if apply_relu:
        y = jnp.maximum(y, 0.0)
    o_ref[...] = y.astype(o_ref.dtype)


def _pick_chunk_rows(H, Wp, Cin, Cout, d):
    """Output image-rows per grid step for the fused 3x3 conv.

    Sized so the double-buffered input slab + output tile + f32 accumulator
    stay well inside VMEM on every generation, while keeping the halo re-read
    overhead bounded for the large ASPP dilations.
    """
    per_out_row = Cout * (2 * 2 + 4)      # bf16 out (x2 buffers) + f32 acc
    per_in_row = Cin * 2 * 2              # bf16 in  (x2 buffers)
    halo = 2 * d + 1                      # extra input image-rows per chunk
    whole = H * Wp * per_out_row + (H + halo) * Wp * per_in_row
    if whole <= 24 * 1024 * 1024:         # whole image fits comfortably
        return H
    budget = 10 * 1024 * 1024
    th = (budget - halo * Wp * per_in_row) // (Wp * (per_out_row + per_in_row))
    th = max(th, d)                       # bound halo re-reads (~<=3x)
    return int(max(1, min(H, th)))


def conv3x3_same(x, p, dilation=1, relu=True, out_dtype=jnp.bfloat16,
                 chunk_rows=None):
    N, H, W, Cin = x.shape
    d = dilation
    w9 = p["w"]                                   # (9, Cin, Cout), BN folded
    Cout = w9.shape[-1]
    # Statically dead taps: an offset that pushes every sample off the map
    # only ever reads zero padding -> drop it.
    live = [(ky, kx) for ky in range(3) for kx in range(3)
            if abs(ky - 1) * d <= H - 1 and abs(kx - 1) * d <= W - 1]
    if live == [(1, 1)]:
        # Dilation exceeds the map (small-map dilated ASPP branches): exactly
        # a 1x1 conv with the centre tap.
        out = matmul_bias(x.reshape(-1, Cin), w9[4], p["shift"], relu,
                          out_dtype)
        return out.reshape(N, H, W, Cout)

    Wp = W + 2 * d
    T = len(live)

    # --- output-row chunking: bounds VMEM, adds a spatial "parallel" axis ---
    if chunk_rows is None:
        chunk_rows = _pick_chunk_rows(H, Wp, Cin, Cout, d)
    TH = max(1, min(H, int(chunk_rows)))
    C = -(-H // TH)                               # ceil
    Hc = TH + 2 * d + 1                           # image rows per chunk (the
    Rc = Hc * Wp                                  #  +1 absorbs flat overrun)
    TMo = TH * Wp

    pad_bottom = C * TH + d + 1 - H               # keeps the last chunk slice
    xpad = jnp.pad(x.astype(jnp.bfloat16),        #  in bounds
                   ((0, 0), (d, pad_bottom), (d, d), (0, 0)))
    if C == 1:
        chunks = xpad[:, None]                    # (N, 1, Hc, Wp, Cin)
    else:
        chunks = jnp.stack([xpad[:, c * TH: c * TH + Hc] for c in range(C)],
                           axis=1)                # (N, C, Hc, Wp, Cin)
    xflat = chunks.reshape(N, C, Rc, Cin)

    offsets = tuple(ky * d * Wp + kx * d for (ky, kx) in live)
    if T == 9:
        w_taps = w9
    else:
        w_taps = jnp.concatenate([w9[3 * ky + kx][None] for (ky, kx) in live],
                                 axis=0)
    b = p["shift"].astype(jnp.float32).reshape(1, -1)

    deep = Cin <= 64                              # deep-K path for small Cin
    if deep:
        w_arg = w_taps.reshape(T * Cin, Cout)
        w_spec = pl.BlockSpec((T * Cin, Cout), lambda n, c: (0, 0))
    else:
        w_arg = w_taps
        w_spec = pl.BlockSpec((T, Cin, Cout), lambda n, c: (0, 0, 0))

    out = pl.pallas_call(
        functools.partial(_conv3x3_kernel, offsets, deep, relu),
        out_shape=jax.ShapeDtypeStruct((N, C, TMo, Cout), out_dtype),
        grid_spec=pltpu.PrefetchScalarGridSpec(
            num_scalar_prefetch=0,
            grid=(N, C),
            in_specs=[
                pl.BlockSpec((None, None, Rc, Cin), lambda n, c: (n, c, 0, 0)),
                w_spec,
                pl.BlockSpec((1, Cout), lambda n, c: (0, 0)),
            ],
            out_specs=pl.BlockSpec((None, None, TMo, Cout),
                                   lambda n, c: (n, c, 0, 0)),
        ),
        compiler_params=pltpu.CompilerParams(
            dimension_semantics=("parallel", "parallel"),
            vmem_limit_bytes=_VMEM_LIMIT),
    )(xflat, w_arg, b)
    # rows are (C*TH, Wp); only the first H rows / W cols are valid output
    return out.reshape(N, C * TH, Wp, Cout)[:, :H, :W, :]


# ----------------------------------------------------------------------------
# Conv dispatcher (1x1 / fused 3x3 / strided im2col) + bilinear-as-matmul
# ----------------------------------------------------------------------------
def im2col(x, k, stride=1, padding=0, dilation=1):
    N, H, W, C = x.shape
    xp = jnp.pad(x, ((0, 0), (padding, padding), (padding, padding), (0, 0)))
    Ho = (H + 2 * padding - dilation * (k - 1) - 1) // stride + 1
    Wo = (W + 2 * padding - dilation * (k - 1) - 1) // stride + 1
    cols = []
    for ky in range(k):
        for kx in range(k):
            y0, x0 = ky * dilation, kx * dilation
            patch = xp[:, y0:y0 + stride * (Ho - 1) + 1:stride,
                       x0:x0 + stride * (Wo - 1) + 1:stride, :]
            cols.append(patch)
    return jnp.concatenate(cols, axis=-1), Ho, Wo


def conv_block(x, p, k, stride=1, padding=0, dilation=1, relu=True,
               out_dtype=jnp.bfloat16):
    N, H, W, Cin = x.shape
    if k == 1:
        out = matmul_bias(x.reshape(-1, Cin), p["w"], p["shift"], relu,
                          out_dtype)
        return out.reshape(N, H, W, -1)
    if stride == 1 and padding == dilation:
        return conv3x3_same(x, p, dilation, relu, out_dtype)
    # Strided convs (backbone stand-in only, K <= 216): im2col + matmul.
    cols, Ho, Wo = im2col(x, k, stride, padding, dilation)
    w2d = p["w"].reshape(-1, p["w"].shape[-1])
    out = matmul_bias(cols.reshape(-1, cols.shape[-1]), w2d, p["shift"],
                      relu, out_dtype)
    return out.reshape(N, Ho, Wo, -1)


def _interp_matrix(n_in, n_out):
    """1-D interpolation matrix for bilinear, align_corners=True."""
    if n_in == n_out:
        return jnp.eye(n_out, dtype=jnp.float32)
    scale = (n_in - 1) / (n_out - 1) if n_out > 1 else 0.0
    pos = jnp.arange(n_out, dtype=jnp.float32) * scale
    idx = jnp.arange(n_in, dtype=jnp.float32)
    return jnp.maximum(0.0, 1.0 - jnp.abs(pos[:, None] - idx[None, :]))


def bilinear_ac(x, oh, ow):
    """F.interpolate(..., 'bilinear', align_corners=True), separable matmuls.

    Stays in the activation dtype (bf16 path stays bf16; f32 accumulation in
    the dots) instead of upcasting the whole tensor.
    """
    N, H, W, C = x.shape
    if (H, W) == (oh, ow):
        return x
    ry = _interp_matrix(H, oh).astype(x.dtype)     # (oh, H)
    rx = _interp_matrix(W, ow).astype(x.dtype)     # (ow, W)
    y = jnp.einsum('oh,nhwc->nowc', ry, x,
                   preferred_element_type=jnp.float32).astype(x.dtype)
    y = jnp.einsum('pw,nowc->nopc', rx, y,
                   preferred_element_type=jnp.float32).astype(x.dtype)
    return y


# ----------------------------------------------------------------------------
# Deterministic parameter construction (conv weight with BN folded in)
# ----------------------------------------------------------------------------
def make_conv_bn(key, cin, cout, k, with_bn=True):
    kw, kb, kg, kbe, km, kv = jax.random.split(key, 6)
    w = jax.random.normal(kw, (k, k, cin, cout), jnp.float32)
    w = w * (1.0 / (k * k * cin) ** 0.5)
    b = 0.01 * jax.random.normal(kb, (cout,), jnp.float32)
    if with_bn:
        gamma = 1.0 + 0.1 * jax.random.normal(kg, (cout,), jnp.float32)
        beta = 0.1 * jax.random.normal(kbe, (cout,), jnp.float32)
        mean = 0.1 * jax.random.normal(km, (cout,), jnp.float32)
        var = 1.0 + 0.1 * jax.random.uniform(kv, (cout,), jnp.float32)
        scale = gamma / jnp.sqrt(var + 1e-5)
        shift = (b - mean) * scale + beta
    else:
        scale = jnp.ones((cout,), jnp.float32)
        shift = b
    w = w * scale                               # fold BN scale (inference)
    w = w.reshape(cin, cout) if k == 1 else w.reshape(k * k, cin, cout)
    return {"w": w.astype(jnp.bfloat16), "shift": shift.astype(jnp.float32)}


def make_params(key, num_classes):
    specs = {
        # simplified backbone stand-in (see TODO at top)
        "bb0": (3, 16, 3, True),
        "bb1": (16, 24, 3, True),
        "bb2": (24, 32, 3, True),
        "bb3": (32, 320, 3, True),
        # ASPP (dim_in=320, dim_out=256, rate = 16 // 8 = 2)
        "aspp_b1": (320, 256, 1, True),
        "aspp_b2": (320, 256, 3, True),
        "aspp_b3": (320, 256, 3, True),
        "aspp_b4": (320, 256, 3, True),
        "aspp_b5": (320, 256, 1, True),
        "aspp_cat": (256 * 5, 256, 1, True),
        # decoder
        "sc_l2": (32, 64, 1, True),
        "catUp1": (64 + 256, 256, 3, True),
        "sc_l1": (24, 48, 1, True),
        "catUp2": (256 + 48, 256, 3, True),
        "conv33": (256, 256, 3, True),
        "cls": (256, num_classes, 1, False),
    }
    keys = jax.random.split(key, len(specs))
    return {name: make_conv_bn(k, *spec)
            for k, (name, spec) in zip(keys, specs.items())}


# ----------------------------------------------------------------------------
# MSLNet forward
# ----------------------------------------------------------------------------
def mslnet_forward(params, x_nchw):
    x = jnp.transpose(x_nchw, (0, 2, 3, 1)).astype(jnp.bfloat16)  # NCHW->NHWC
    N, H, W, _ = x.shape

    # --- backbone stand-in (see TODO at top) ---
    h = conv_block(x, params["bb0"], 3, stride=2, padding=1)
    l1 = conv_block(h, params["bb1"], 3, stride=2, padding=1)       # H/4, 24
    l2 = conv_block(l1, params["bb2"], 3, stride=2, padding=1)      # H/8, 32
    l4 = conv_block(l2, params["bb3"], 3, padding=2, dilation=2)    # H/8, 320

    # --- ASPP, rate = 16 // downsample_factor(8) = 2 ---
    rate = 2
    b1 = conv_block(l4, params["aspp_b1"], 1)
    b2 = conv_block(l4, params["aspp_b2"], 3, padding=6 * rate, dilation=6 * rate)
    b3 = conv_block(l4, params["aspp_b3"], 3, padding=12 * rate, dilation=12 * rate)
    b4 = conv_block(l4, params["aspp_b4"], 3, padding=18 * rate, dilation=18 * rate)
    gf = jnp.mean(l4.astype(jnp.float32), axis=(1, 2),
                  keepdims=True).astype(jnp.bfloat16)
    gf = conv_block(gf, params["aspp_b5"], 1)
    gf = jnp.broadcast_to(gf, (N, l4.shape[1], l4.shape[2], gf.shape[-1]))
    feature_cat = jnp.concatenate([b1, b2, b3, b4, gf], axis=-1)
    up1 = conv_block(feature_cat, params["aspp_cat"], 1)

    # --- decoder ---
    l2s = conv_block(l2, params["sc_l2"], 1)
    up2 = conv_block(jnp.concatenate([up1, l2s], axis=-1),
                     params["catUp1"], 3, padding=1)
    l1s = conv_block(l1, params["sc_l1"], 1)
    up2 = bilinear_ac(up2, l1.shape[1], l1.shape[2])
    y = conv_block(jnp.concatenate([up2, l1s], axis=-1),
                   params["catUp2"], 3, padding=1)
    y = conv_block(y, params["conv33"], 3, padding=1)   # DCN -> plain 3x3 (TODO)
    y = conv_block(y, params["cls"], 1, relu=False, out_dtype=jnp.float32)
    y = bilinear_ac(y, H, W)
    return jnp.transpose(y, (0, 3, 1, 2))               # NHWC -> NCHW


if __name__ == "__main__":
    key = jax.random.PRNGKey(0)
    pkey, xkey = jax.random.split(key)

    # --- self-test: row-chunked fused 3x3 conv == whole-image fused conv ---
    # (exercises the C>1 chunked path and the deep-K small-Cin path, which the
    #  tiny end-to-end shapes below would otherwise not cover)
    t1, t2, t3, t4 = jax.random.split(jax.random.PRNGKey(42), 4)
    xa = jax.random.normal(t1, (1, 12, 9, 16), jnp.float32).astype(jnp.bfloat16)
    pa = make_conv_bn(t2, 16, 32, 3)
    ya = conv3x3_same(xa, pa, dilation=1)                 # whole image
    yb = conv3x3_same(xa, pa, dilation=1, chunk_rows=5)   # 3 row chunks
    assert bool(jnp.allclose(ya.astype(jnp.float32), yb.astype(jnp.float32),
                             atol=1e-2, rtol=1e-2))
    xc = jax.random.normal(t3, (1, 12, 9, 96), jnp.float32).astype(jnp.bfloat16)
    pc = make_conv_bn(t4, 96, 64, 3)
    yc = conv3x3_same(xc, pc, dilation=1)
    yd = conv3x3_same(xc, pc, dilation=1, chunk_rows=5)
    assert bool(jnp.allclose(yc.astype(jnp.float32), yd.astype(jnp.float32),
                             atol=1e-2, rtol=1e-2))

    # --- end-to-end forward ---
    num_classes = 4
    params = make_params(pkey, num_classes)
    x = jax.random.normal(xkey, (2, 3, 32, 32), jnp.float32)

    fwd = jax.jit(mslnet_forward)
    out = fwd(params, x)
    jax.block_until_ready(out)
    assert out.shape == (2, num_classes, 32, 32), out.shape
    assert bool(jnp.all(jnp.isfinite(out)))
    print("KERNEL_OK")
</pallas_src>

<mosaic_0001>
module attributes {stable_mosaic.version = 11 : i64} {
  func.func @_conv3x3_kernel(%arg0: i32, %arg1: i32, %arg2: memref<1x1x165x16xbf16, #tpu.memory_space<vmem>>, %arg3: memref<144x32xbf16, #tpu.memory_space<vmem>>, %arg4: memref<1x32xf32, #tpu.memory_space<vmem>>, %arg5: memref<1x1x132x32xbf16, #tpu.memory_space<vmem>>) attributes {dimension_semantics = [#tpu.dimension_semantics<parallel>, #tpu.dimension_semantics<parallel>], iteration_bounds = array<i64: 1, 1>, scalar_prefetch = 0 : i64, scratch_operands = 0 : i64, tpu.core_type = #tpu.core_type<tc>, window_params = [{transform_indices = @transform_0, window_bounds = array<i64: 1, 1, 165, 16>}, {pipeline_mode = #tpu.pipeline_mode<synchronous>, transform_indices = @transform_1, window_bounds = array<i64: 144, 32>}, {pipeline_mode = #tpu.pipeline_mode<synchronous>, transform_indices = @transform_2, window_bounds = array<i64: 1, 32>}, {transform_indices = @transform_3, window_bounds = array<i64: 1, 1, 132, 32>}]} {
    %c0 = arith.constant 0 : index
    %c0_0 = arith.constant 0 : index
    %c0_1 = arith.constant 0 : index
    %c0_2 = arith.constant 0 : index
    %0 = vector.load %arg2[%c0, %c0_0, %c0_1, %c0_2] : memref<1x1x165x16xbf16, #tpu.memory_space<vmem>>, vector<1x1x132x16xbf16>
    %1 = vector.shape_cast %0 : vector<1x1x132x16xbf16> to vector<132x16xbf16>
    %c0_3 = arith.constant 0 : index
    %c0_4 = arith.constant 0 : index
    %c1 = arith.constant 1 : index
    %c0_5 = arith.constant 0 : index
    %2 = vector.load %arg2[%c0_3, %c0_4, %c1, %c0_5] : memref<1x1x165x16xbf16, #tpu.memory_space<vmem>>, vector<1x1x132x16xbf16>
    %3 = vector.shape_cast %2 : vector<1x1x132x16xbf16> to vector<132x16xbf16>
    %c0_6 = arith.constant 0 : index
    %c0_7 = arith.constant 0 : index
    %c2 = arith.constant 2 : index
    %c0_8 = arith.constant 0 : index
    %4 = vector.load %arg2[%c0_6, %c0_7, %c2, %c0_8] : memref<1x1x165x16xbf16, #tpu.memory_space<vmem>>, vector<1x1x132x16xbf16>
    %5 = vector.shape_cast %4 : vector<1x1x132x16xbf16> to vector<132x16xbf16>
    %c0_9 = arith.constant 0 : index
    %c0_10 = arith.constant 0 : index
    %c11 = arith.constant 11 : index
    %c0_11 = arith.constant 0 : index
    %6 = vector.load %arg2[%c0_9, %c0_10, %c11, %c0_11] : memref<1x1x165x16xbf16, #tpu.memory_space<vmem>>, vector<1x1x132x16xbf16>
    %7 = vector.shape_cast %6 : vector<1x1x132x16xbf16> to vector<132x16xbf16>
    %c0_12 = arith.constant 0 : index
    %c0_13 = arith.constant 0 : index
    %c12 = arith.constant 12 : index
    %c0_14 = arith.constant 0 : index
    %8 = vector.load %arg2[%c0_12, %c0_13, %c12, %c0_14] : memref<1x1x165x16xbf16, #tpu.memory_space<vmem>>, vector<1x1x132x16xbf16>
    %9 = vector.shape_cast %8 : vector<1x1x132x16xbf16> to vector<132x16xbf16>
    %c0_15 = arith.constant 0 : index
    %c0_16 = arith.constant 0 : index
    %c13 = arith.constant 13 : index
    %c0_17 = arith.constant 0 : index
    %10 = vector.load %arg2[%c0_15, %c0_16, %c13, %c0_17] : memref<1x1x165x16xbf16, #tpu.memory_space<vmem>>, vector<1x1x132x16xbf16>
    %11 = vector.shape_cast %10 : vector<1x1x132x16xbf16> to vector<132x16xbf16>
    %c0_18 = arith.constant 0 : index
    %c0_19 = arith.constant 0 : index
    %c22 = arith.constant 22 : index
    %c0_20 = arith.constant 0 : index
    %12 = vector.load %arg2[%c0_18, %c0_19, %c22, %c0_20] : memref<1x1x165x16xbf16, #tpu.memory_space<vmem>>, vector<1x1x132x16xbf16>
    %13 = vector.shape_cast %12 : vector<1x1x132x16xbf16> to vector<132x16xbf16>
    %c0_21 = arith.constant 0 : index
    %c0_22 = arith.constant 0 : index
    %c23 = arith.constant 23 : index
    %c0_23 = arith.constant 0 : index
    %14 = vector.load %arg2[%c0_21, %c0_22, %c23, %c0_23] : memref<1x1x165x16xbf16, #tpu.memory_space<vmem>>, vector<1x1x132x16xbf16>
    %15 = vector.shape_cast %14 : vector<1x1x132x16xbf16> to vector<132x16xbf16>
    %c0_24 = arith.constant 0 : index
    %c0_25 = arith.constant 0 : index
    %c24 = arith.constant 24 : index
    %c0_26 = arith.constant 0 : index
    %16 = vector.load %arg2[%c0_24, %c0_25, %c24, %c0_26] : memref<1x1x165x16xbf16, #tpu.memory_space<vmem>>, vector<1x1x132x16xbf16>
    %17 = vector.shape_cast %16 : vector<1x1x132x16xbf16> to vector<132x16xbf16>
    %18 = tpu.concatenate %1, %3, %5, %7, %9, %11, %13, %15, %17 in 1 : vector<132x16xbf16>, vector<132x16xbf16>, vector<132x16xbf16>, vector<132x16xbf16>, vector<132x16xbf16>, vector<132x16xbf16>, vector<132x16xbf16>, vector<132x16xbf16>, vector<132x16xbf16> -> vector<132x144xbf16>
    %c0_27 = arith.constant 0 : index
    %c0_28 = arith.constant 0 : index
    %19 = vector.load %arg3[%c0_27, %c0_28] : memref<144x32xbf16, #tpu.memory_space<vmem>>, vector<144x32xbf16>
    %cst = arith.constant dense<0.000000e+00> : vector<132x32xf32>
    %20 = tpu.matmul %18, %19, %cst {dimension_numbers = #tpu.dot_dimension_numbers<[1], [0], [0], [1], [0, 0, 1, 1], [], []>} : vector<132x144xbf16>, vector<144x32xbf16>, vector<132x32xf32> -> vector<132x32xf32>
    %c0_29 = arith.constant 0 : index
    %c0_30 = arith.constant 0 : index
    %21 = vector.load %arg4[%c0_29, %c0_30] : memref<1x32xf32, #tpu.memory_space<vmem>>, vector<1x32xf32>
    %22 = vector.broadcast %21 : vector<1x32xf32> to vector<132x32xf32>
    %23 = arith.addf %20, %22 : vector<132x32xf32>
    %cst_31 = arith.constant 0.000000e+00 : f32
    %24 = vector.broadcast %cst_31 : f32 to vector<132x32xf32>
    %25 = arith.maximumf %23, %24 : vector<132x32xf32>
    %26 = arith.truncf %25 : vector<132x32xf32> to vector<132x32xbf16>
    %c0_32 = arith.constant 0 : index
    %c0_33 = arith.constant 0 : index
    %c0_34 = arith.constant 0 : index
    %c0_35 = arith.constant 0 : index
    %27 = vector.load %arg5[%c0_32, %c0_33, %c0_34, %c0_35] : memref<1x1x132x32xbf16, #tpu.memory_space<vmem>>, vector<1x1x132x32xbf16>
    %28 = vector.shape_cast %27 : vector<1x1x132x32xbf16> to vector<132x32xbf16>
    %29 = vector.shape_cast %26 : vector<132x32xbf16> to vector<1x1x132x32xbf16>
    tpu.vector_store %arg5[%c0_32, %c0_33, %c0_34, %c0_35], %29 {strides = array<i32>} : memref<1x1x132x32xbf16, #tpu.memory_space<vmem>>, vector<1x1x132x32xbf16>,
    return
  }
  func.func @transform_0(%arg0: i32, %arg1: i32) -> (i32, i32, i32, i32) {
    %c0_i32 = arith.constant 0 : i32
    %c0_i32_0 = arith.constant 0 : i32
    %c0_i32_1 = arith.constant 0 : i32
    return %arg0, %arg1, %c0_i32, %c0_i32_0 : i32, i32, i32, i32
  }
  func.func @transform_1(%arg0: i32, %arg1: i32) -> (i32, i32) {
    %c0_i32 = arith.constant 0 : i32
    %c0_i32_0 = arith.constant 0 : i32
    %c0_i32_1 = arith.constant 0 : i32
    return %c0_i32, %c0_i32_0 : i32, i32
  }
  func.func @transform_2(%arg0: i32, %arg1: i32) -> (i32, i32) {
    %c0_i32 = arith.constant 0 : i32
    %c0_i32_0 = arith.constant 0 : i32
    %c0_i32_1 = arith.constant 0 : i32
    return %c0_i32, %c0_i32_0 : i32, i32
  }
  func.func @transform_3(%arg0: i32, %arg1: i32) -> (i32, i32, i32, i32) {
    %c0_i32 = arith.constant 0 : i32
    %c0_i32_0 = arith.constant 0 : i32
    %c0_i32_1 = arith.constant 0 : i32
    return %arg0, %arg1, %c0_i32, %c0_i32_0 : i32, i32, i32, i32
  }
}

</mosaic_0001>

<bundles_post_ra>
// kernel: tpu_custom_call.1
= control target key start
LH: loop header
LB: loop body
LE: loop exit
PB: predicated region body
PF: predicated region fallthrough
CT: control target
= control target key end

     0   :  { %vm182_vm0 = vcmask 1046528   ;;  %vm335_vm1 = vcmask 1045504   ;;  %s1119_s22 = smov 32   ;;  %s1120_s23 = smov 64   ;;  %vm89_vm2 = vsmask.f32 7424  ;;  %s1946_s0 = inlined_call_operand.vmem [shape: bf16[1,1,165,16], index: 0, kind: input, shape index: {}]   ;;  %s1947_s1 = inlined_call_operand.vmem [shape: bf16[144,32], index: 1, kind: input, shape index: {}]   ;;  %s1948_s2 = inlined_call_operand.vmem [shape: f32[1,32], index: 2, kind: input, shape index: {}]   ;;  %s1949_s3 = inlined_call_operand.vmem [shape: bf16[1,1,132,32], index: 3, kind: output, shape index: {}]  }
   0x1   :  { %v1149_v0 = vld [vmem:[%s1946_s0 + $0x20] sm:$0xff]   ;;  %v1154_v1 = vld [vmem:[%s1946_s0 + $0x28] sm:$0xff]   ;;  %v1188_v16 = vld [vmem:[%s1946_s0 + $0x30] sm:$0xff]   ;;  %vm233_vm3 = vsmask.f32 6400  ;;  %vm447_vm4 = vcmask 1044480  }
   0x2   :  { %v1159_v2 = vld [vmem:[%s1946_s0 + $0x24] sm:$0xff]   ;;  %v190_v3 = vrot.slane %v1149_v0, 1  ;;  %v192_v4 = vrot.slane %v1154_v1, 1  ;;  %v1166_v5 = vld [vmem:[%s1946_s0 + $0x2c] sm:$0xff]   ;;  %v122_v6 = vshll.u32 %v1149_v0, 16  ;;  %v126_v7 = vshrl.u32 %v1149_v0, 16 }
   0x3   :  { %v343_v8 = vrot.slane %v1159_v2, 2  ;;  %v130_v9 = vshll.u32 %v1154_v1, 16  ;;  %v270_v10 = vshrl.u32 %v1159_v2, 16  ;;  %v273_v11 = vshll.u32 %v1159_v2, 16  ;;  %v1209_v28 = vld [vmem:[%s1946_s0] sm:$0xff]   ;;  %v1218_v31 = vld [vmem:[%s1946_s0 + $0x8] sm:$0xff]  }
   0x4   :  { %v193_v12 = vsel %vm182_vm0, %v190_v3, %v192_v4  ;;  %v345_v13 = vrot.slane %v1166_v5, 2  ;;  %v1182_v14 = vrot.slane %v122_v6, 1  ;;  %v279_v15 = vshrl.u32 %v1166_v5, 16  ;;  %v1234_v40 = vld [vmem:[%s1946_s0 + $0x10] sm:$0xff]   ;;  %v34_v41 = vld [vmem:[%s1946_s0 + $0x4] sm:$0xe] }
   0x5   :  { %208 = vrot.lane.b32.xlu0 %v193_v12, %s1119_s22  ;;  %v1191_v17 = vrot.slane %v130_v9, 1  ;;  %v272_v18 = vrot.slane %v270_v10, 1  ;;  %v275_v19 = vrot.slane %v273_v11, 2  ;;  %v282_v20 = vshll.u32 %v1166_v5, 16  ;;  %s1121_s5 = smov 16   ;;  %s1122_s6 = smov 48  }
   0x6   :  { %v346_v21 = vsel %vm335_vm1, %v343_v8, %v345_v13  ;;  %v128_v22 = vor.u32 %v126_v7, %v1182_v14  ;;  %v281_v23 = vrot.slane %v279_v15, 1  ;;  %v134_v24 = vshrl.u32 %v1154_v1, 16  ;;  %s1123_s7 = smov 96   ;;  %s1124_s16 = smov 112  }
   0x7   :  { %361 = vrot.lane.b32.xlu1 %v346_v21, %s1120_s23  ;;  %v284_v25 = vrot.slane %v282_v20, 2  ;;  %v138_v26 = vshll.u32 %v1188_v16, 16  ;;  %v142_v27 = vshrl.u32 %v1188_v16, 16  ;;  %v1211_v29 = vor.u32 %v275_v19, %v272_v18  ;;  %v1282_v19 = vld [vmem:[%s1946_s0 + $0x34] sm:$0xff]   ;;  %v1058_v21 = vld [vmem:[%s1946_s0] sm:$0xe] }
   0x8   :  { %v507_v30 = vrot.slane %v134_v24, 3  ;;  %v508_v33 = vrot.slane %v130_v9, 4  ;;  %v133_v36 = vsel %vm89_vm2, %v128_v22, %v1191_v17  ;;  %v93_v37 = vshll.u32 %v1209_v28, 16  ;;  %s1125_s17 = smov 80  }
   0x9   :  { %v1220_v32 = vor.u32 %v284_v25, %v281_v23  ;;  %v511_v34 = vrot.slane %v142_v27, 3  ;;  %v512_v35 = vrot.slane %v138_v26, 4  ;;  %v91_v38 = vshrl.u32 %v1209_v28, 16 }
   0xa   :  { %v98_v39 = vshll.u32 %v1218_v31, 16  ;;  %v95_v43 = vrot.slane %v93_v37, 1  ;;  %v455_v44 = vrot.slane %v1154_v1, 3  ;;  %v457_v45 = vrot.slane %v1188_v16, 3 }
   0xb   :  { %v286_v42 = vsel %vm233_vm3, %v1211_v29, %v1220_v32  ;;  %v1245_v46 = vor.u32 %v508_v33, %v507_v30  ;;  %v1247_v47 = vor.u32 %v512_v35, %v511_v34  ;;  %v1019_v48 = vunpack.c.l.b16 %v1218_v31 }
   0xc   :  { %v1020_v49 = vunpack.c.h.b16 %v1218_v31  ;;  %vm486_vm5 = vsmask.f32 4352  ;;  %v458_v50 = vsel %vm447_vm4, %v455_v44, %v457_v45  ;;  %v1023_v51 = vunpack.c.l.b16 %v1234_v40 }
   0xd   :  { %169 = vrot.lane.b32.xlu0 %v133_v36, %s1121_s5  ;;  %v221_v52 = vunpack.c.l.b16 %v34_v41  ;;  %v96_v53 = vor.u32 %v95_v43, %v91_v38  ;;  %v1258_v54 = vrot.slane %v98_v39, 1  ;;  %473 = vrot.lane.b32.xlu2 %v458_v50, %s1123_s7  ;;  %v395_v55 = vrot.slane %v270_v10, 2 }
   0xe   :  { %v396_v56 = vrot.slane %v273_v11, 3  ;;  %v1263_v58 = vpack.c.b16 %v1023_v51, %v1020_v49  ;;  %v399_v59 = vrot.slane %v279_v15, 2  ;;  %v514_v60 = vsel %vm486_vm5, %v1245_v46, %v1247_v47  ;;  %v37_v11 = vld [vmem:[%s1946_s0 + $0x4] sm:$0xc] }
   0xf   :  { %322 = vrot.lane.b32.xlu1 %v286_v42, %s1122_s6  ;;  %v224_v57 = vpack.c.b16 %v1019_v48, %v221_v52  ;;  %vm374_vm6 = vsmask.f32 5376  ;;  %v400_v62 = vrot.slane %v282_v20, 3  ;;  %v101_v15 = vsel %vm89_vm2, %v96_v53, %v1258_v54  ;;  %v1057_v20 = vld [vmem:[%s1946_s0] sm:$0xf0] }
  0x10   :  { %v1268_v61 = vor.u32 %v396_v56, %v395_v55  ;;  %v243_v12 = vshrl.u32 %v1263_v58, 16  ;;  %v246_v10 = vshll.u32 %v1263_v58, 16  ;;  %v136_v34 = vor.u32 %v134_v24, %v1191_v17  ;;  %v39_v55 = vld [vmem:[%s1946_s0 + $0x8] sm:$0x8] }
  0x11   :  { %v235_v63 = vshrl.u32 %v224_v57, 16  ;;  %v238_v9 = vshll.u32 %v224_v57, 16  ;;  %v1277_v18 = vor.u32 %v400_v62, %v399_v59  ;;  %v1299_v35 = vrot.slane %v138_v26, 1 }
  0x12   :  { %v245_v25 = vrot.slane %v243_v12, 1  ;;  %v248_v30 = vrot.slane %v246_v10, 2  ;;  %v333_v36 = vunpack.c.l.b16 %v37_v11  ;;  %v1059_v37 = vor.u32 %v1058_v21, %v1057_v20 }
  0x13   :  { %v237_v22 = vrot.slane %v235_v63, 1  ;;  %v240_v23 = vrot.slane %v238_v9, 2  ;;  %v402_v33 = vsel %vm374_vm6, %v1268_v61, %v1277_v18  ;;  %v288_v38 = vshrl.u32 %v1282_v19, 16 }
  0x14   :  { %v291_v39 = vshll.u32 %v1282_v19, 16  ;;  %v1305_v42 = vor.u32 %v248_v30, %v245_v25  ;;  %v183_v43 = vrot.slane %v1059_v37, 1  ;;  %v184_v17 = vrot.slane %v1218_v31, 1 }
  0x15   :  { %545 = vrot.lane.b32.xlu0 %v514_v60, %s1124_s16  ;;  %428 = vrot.lane.b32.xlu2 %v402_v33, %s1125_s17  ;;  %v241_v41 = vor.u32 %v240_v23, %v237_v22  ;;  %v141_v24 = vsel %vm89_vm2, %v136_v34, %v1299_v35  ;;  %v334_v26 = vpack.c.b16 %v1019_v48, %v333_v36  ;;  %v290_v50 = vrot.slane %v288_v38, 1 }
  0x16   :  { %v293_v51 = vrot.slane %v291_v39, 2  ;;  %v185_v53 = vsel %vm182_vm0, %v183_v43, %v184_v17  ;;  %v337_v57 = vrot.slane %v1263_v58, 2  ;;  %v441_v59 = vunpack.c.l.b16 %v39_v55  ;;  %v1012_v55 = vld [vmem:[%s1947_s1 + $0x40] sm:$0xff] }
  0x17   :  { %161 = vrot.lane.b32.xlu1 %v101_v15, %s1121_s5  ;;  %v250_v52 = vsel %vm233_vm3, %v241_v41, %v1305_v42  ;;  %v336_v56 = vrot.slane %v334_v26, 2  ;;  %v194_v60 = vrot.slane %v1188_v16, 1  ;;  %v376_v62 = vshrl.u32 %v334_v26, 16  ;;  %856 = vmatpush.bf16.msra.mxu1 %v1012_v55 }
  0x18   :  { %v1321_v48 = vor.u32 %v293_v51, %v290_v50  ;;  %v379_v63 = vshll.u32 %v334_v26, 16  ;;  %v444_v15 = vpack.c.b16 %v1020_v49, %v441_v59  ;;  %v383_v23 = vrot.slane %v243_v12, 2  ;;  %v1360_v51 = vld [vmem:[%s1946_s0 + $0x38] sm:$0xff]   ;;  %1108 = vmatpush.bf16.msra.mxu3 %v1012_v55 }
  0x19   :  { %v338_v9 = vsel %vm335_vm1, %v336_v56, %v337_v57  ;;  %v195_v20 = vsel %vm182_vm0, %v192_v4, %v194_v60  ;;  %v378_v21 = vrot.slane %v376_v62, 2  ;;  %v384_v25 = vrot.slane %v246_v10, 3 }
  0x1a   :  { %v295_v11 = vsel %vm233_vm3, %v1220_v32, %v1321_v48  ;;  %v381_v22 = vrot.slane %v379_v63, 3  ;;  %v347_v30 = vrot.slane %v1282_v19, 2  ;;  %v106_v33 = vshll.u32 %v1234_v40, 16 }
  0x1b   :  { %v110_v32 = vshrl.u32 %v1234_v40, 16  ;;  %v488_v34 = vshrl.u32 %v444_v15, 16  ;;  %v491_v49 = vshll.u32 %v444_v15, 16  ;;  %v448_v36 = vrot.slane %v444_v15, 3 }
  0x1c   :  { %v449_v4 = vrot.slane %v1234_v40, 3  ;;  %v382_v37 = vor.u32 %v381_v22, %v378_v21  ;;  %v1345_v12 = vor.u32 %v384_v25, %v383_v23  ;;  %v348_v10 = vsel %vm335_vm1, %v345_v13, %v347_v30 }
  0x1d   :  { %171 = vrot.lane.b32.xlu0 %v141_v24, %s1121_s5  ;;  %200 = vrot.lane.b32.xlu2 %v185_v53, %s1119_s22  ;;  %v490_v41 = vrot.slane %v488_v34, 3  ;;  %v493_v43 = vrot.slane %v491_v49, 4  ;;  %v495_v24 = vrot.slane %v110_v32, 3  ;;  %v496_v26 = vrot.slane %v106_v33, 4 }
  0x1e   :  { %v450_v50 = vsel %vm447_vm4, %v448_v36, %v449_v4  ;;  %v403_v53 = vrot.slane %v288_v38, 2  ;;  %v404_v13 = vrot.slane %v291_v39, 3  ;;  %v459_v62 = vrot.slane %v1360_v51, 3 }
  0x1f   :  { %314 = vrot.lane.b32.xlu1 %v250_v52, %s1122_s6  ;;  %v386_v52 = vsel %vm374_vm6, %v382_v37, %v1345_v12  ;;  %v494_v56 = vor.u32 %v493_v43, %v490_v41  ;;  %v1368_v59 = vor.u32 %v496_v26, %v495_v24  ;;  %v146_v38 = vshll.u32 %v1360_v51, 16 }
  0x20   :  { %v1373_v63 = vor.u32 %v404_v13, %v403_v53  ;;  %v150_v39 = vshrl.u32 %v1360_v51, 16  ;;  %vm557_vm7 = vcmask 130048   ;;  %v102_v15 = vshrl.u32 %v1218_v31, 16 }
  0x21   :  { %995 = vmatmul.msk.bf16.vlgmr.msra.gmra.mxu1 %vm557_vm7, %v1263_v58  ;;  %v460_v21 = vsel %vm447_vm4, %v457_v45, %v459_v62  ;;  %v516_v25 = vrot.slane %v146_v38, 4  ;;  %v1406_v49 = vrot.slane %v106_v33, 1  ;;  %v186_v45 = vrot.slane %v1234_v40, 1 }
  0x22   :  { %v406_v22 = vsel %vm374_vm6, %v1277_v18, %v1373_v63  ;;  %v515_v23 = vrot.slane %v150_v39, 3  ;;  %v104_v34 = vor.u32 %v102_v15, %v1258_v54  ;;  %v1436_v53 = vrot.slane %v146_v38, 1 }
  0x23   :  { %v187_v54 = vsel %vm182_vm0, %v184_v17, %v186_v45  ;;  %v144_v17 = vor.u32 %v142_v27, %v1299_v35  ;;  %vm577_vm8 = vcmask 261120   ;;  %vm596_vm9 = vcmask 392192  }
  0x24   :  { %v1413_v18 = vor.u32 %v516_v25, %v515_v23  ;;  %vm615_vm10 = vcmask 523264   ;;  %vm634_vm11 = vcmask 654336   ;;  %vm653_vm12 = vcmask 785408  }
  0x25   :  { %353 = vrot.lane.b32.xlu0 %v338_v9, %s1120_s23  ;;  %210 = vrot.lane.b32.xlu2 %v195_v20, %s1119_s22  ;;  %v1380_v9 = vld [vmem:[%s1946_s0 + $0x3c] sm:$0xff]   ;;  %v1388_v20 = vld [vmem:[%s1946_s0 + $0x14] sm:$0xff]   ;;  %v149_v27 = vsel %vm89_vm2, %v144_v17, %v1436_v53  ;;  %vm672_vm13 = vcmask 916480   ;;  %vm936_vm14 = vcmask 257024   ;;  %vm953_vm15 = vcmask 254976  }
  0x26   :  { %1001 = vmatmul.msk.bf16.vlgmr.msra.gmra.mxu3 %vm557_vm7, %v1380_v9  ;;  %v252_v36 = vshrl.u32 %v1388_v20, 16  ;;  %v255_v37 = vshll.u32 %v1388_v20, 16  ;;  %v518_v33 = vsel %vm486_vm5, %v1247_v47, %v1413_v18  ;;  %v297_v26 = vshrl.u32 %v1380_v9, 16 }
  0x27   :  { %324 = vrot.lane.b32.xlu1 %v295_v11, %s1122_s6  ;;  %v498_v11 = vsel %vm486_vm5, %v494_v56, %v1368_v59 }
  0x28   :  { %v254_v41 = vrot.slane %v252_v36, 1  ;;  %v257_v43 = vrot.slane %v255_v37, 2  ;;  %v299_v13 = vrot.slane %v297_v26, 1  ;;  %v388_v15 = vrot.slane %v255_v37, 3  ;;  %v1010_v37 = vld [vmem:[%s1947_s1 + $0x30] sm:$0xff] }
  0x29   :  { %v407_v23 = vrot.slane %v297_v26, 2  ;;  %v32_v26 = vld [vmem:[%s1946_s0 + $0x40] sm:$0x7] }
  0x2a   :  { %v1426_v24 = vor.u32 %v257_v43, %v254_v41 }
  0x2c   :  { %v259_v47 = vsel %vm233_vm3, %v1305_v42, %v1426_v24  ;;  %v1011_v42 = vld [vmem:[%s1947_s1 + $0x38] sm:$0xff] }
  0x2d   :  { %363 = vrot.lane.b32.xlu0 %v348_v10, %s1120_s23  ;;  %420 = vrot.lane.b32.xlu2 %v386_v52, %s1125_s17  ;;  %v109_v10 = vsel %vm89_vm2, %v104_v34, %v1406_v49  ;;  %v196_v52 = vrot.slane %v1360_v51, 1 }
  0x2e   :  { %1100 = vmatpush.bf16.msra.mxu2 %v1011_v42  ;;  %796 = vmatpush.bf16.msra.mxu0 %v1011_v42 }
  0x2f   :  { %465 = vrot.lane.b32.xlu1 %v450_v50, %s1123_s7  ;;  %v300_v50 = vshll.u32 %v1380_v9, 16  ;;  %v197_v56 = vsel %vm182_vm0, %v194_v60, %v196_v52  ;;  %v339_v60 = vrot.slane %v1388_v20, 2 }
  0x31   :  { %v302_v55 = vrot.slane %v300_v50, 2  ;;  %996 = vmatmul.msk.bf16.gmra.mxu1 %vm557_vm7, %v1388_v20  ;;  %v408_v25 = vrot.slane %v300_v50, 3  ;;  %v1505_v50 = vld [vmem:[%s1946_s0 + $0x1c] sm:$0xff]  }
  0x32   :  { %1101 = vmatpush.bf16.msra.mxu2 %v1010_v37  ;;  %797 = vmatpush.bf16.msra.mxu0 %v1010_v37 }
  0x33   :  { %v1451_v35 = vor.u32 %v302_v55, %v299_v13 }
  0x35   :  { %537 = vrot.lane.b32.xlu0 %v498_v11, %s1124_s16  ;;  %430 = vrot.lane.b32.xlu2 %v406_v22, %s1125_s17  ;;  %v387_v11 = vrot.slane %v252_v36, 2  ;;  %v1467_v22 = vld [vmem:[%s1946_s0 + $0x18] sm:$0xff]   ;;  %v1475_v36 = vld [vmem:[%s1946_s0 + $0x40] sm:$0xff]  }
  0x36   :  { %v520_v41 = vshrl.u32 %v1475_v36, 16  ;;  %v523_v58 = vshll.u32 %v1475_v36, 16  ;;  %v114_v43 = vshll.u32 %v1467_v22, 16 }
  0x37   :  { %475 = vrot.lane.b32.xlu1 %v460_v21, %s1123_s7  ;;  %v1458_v38 = vor.u32 %v388_v15, %v387_v11  ;;  %v304_v21 = vsel %vm233_vm3, %v1321_v48, %v1451_v35  ;;  %v340_v48 = vsel %vm335_vm1, %v337_v57, %v339_v60  ;;  %v349_v57 = vrot.slane %v1380_v9, 2 }
  0x38   :  { %v522_v13 = vrot.slane %v520_v41, 3  ;;  %v525_v55 = vrot.slane %v523_v58, 4  ;;  %v87_v11 = vunpack.c.l.b16 %v32_v26  ;;  %v1006_v41 = vld [vmem:[%s1947_s1 + $0x10] sm:$0xff]  ;;  %v1005_v26 = vld [vmem:[%s1947_s1 + $0x8] sm:$0xff] }
  0x39   :  { %v390_v34 = vsel %vm374_vm6, %v1345_v12, %v1458_v38  ;;  %v1488_v12 = vor.u32 %v408_v25, %v407_v23  ;;  %v1007_v23 = vld [vmem:[%s1947_s1 + $0x18] sm:$0xff] }
  0x3a   :  { %v1533_v42 = vpack.c.b16 %v87_v11, %v87_v11 }
  0x3d   :  { %163 = vrot.lane.b32.xlu0 %v109_v10, %s1121_s5  ;;  %547 = vrot.lane.b32.xlu2 %v518_v33, %s1124_s16  ;;  %v451_v10 = vrot.slane %v1467_v22, 3  ;;  %v1009_v33 = vld [vmem:[%s1947_s1 + $0x28] sm:$0xff] }
  0x3e   :  { %1102 = vmatpush.bf16.msra.mxu2 %v1009_v33  ;;  %798 = vmatpush.bf16.msra.mxu0 %v1009_v33  ;;  %v1567_v33 = vrot.slane %v114_v43, 1 }
  0x3f   :  { %202 = vrot.lane.b32.xlu1 %v187_v54, %s1119_s22  ;;  %v118_v54 = vshrl.u32 %v1467_v22, 16  ;;  %v452_v17 = vsel %vm447_vm4, %v449_v4, %v451_v10  ;;  %v500_v4 = vrot.slane %v114_v43, 4 }
  0x41   :  { %997 = vmatmul.msk.bf16.gmra.mxu1 %vm557_vm7, %v1505_v50  ;;  %v499_v15 = vrot.slane %v118_v54, 3 }
  0x45   :  { %316 = vrot.lane.b32.xlu0 %v259_v47, %s1122_s6  ;;  %173 = vrot.lane.b32.xlu2 %v149_v27, %s1121_s5  ;;  %v410_v47 = vsel %vm374_vm6, %v1373_v63, %v1488_v12  ;;  %v1008_v63 = vld [vmem:[%s1947_s1 + $0x20] sm:$0xff]  ;;  %v461_v27 = vrot.slane %v1475_v36, 3 }
  0x46   :  { %1103 = vmatpush.bf16.msra.mxu2 %v1008_v63  ;;  %799 = vmatpush.bf16.msra.mxu0 %v1008_v63 }
  0x47   :  { %212 = vrot.lane.b32.xlu1 %v197_v56, %s1119_s22  ;;  %v350_v56 = vsel %vm335_vm1, %v347_v30, %v349_v57  ;;  %v1531_v30 = vor.u32 %v525_v55, %v522_v13  ;;  %v462_v25 = vsel %vm447_vm4, %v459_v62, %v461_v27  ;;  %v188_v62 = vrot.slane %v1467_v22, 1 }
  0x4a   :  { %1104 = vmatpush.bf16.msra.mxu2 %v1007_v23  ;;  %800 = vmatpush.bf16.msra.mxu0 %v1007_v23 }
  0x4d   :  { %326 = vrot.lane.b32.xlu0 %v304_v21, %s1122_s6  ;;  %355 = vrot.lane.b32.xlu2 %v340_v48, %s1120_s23  ;;  %v1535_v21 = vor.u32 %v500_v4, %v499_v15  ;;  %v154_v48 = vshll.u32 %v1533_v42, 16  ;;  %v341_v4 = vrot.slane %v1505_v50, 2 }
  0x4e   :  { %1105 = vmatpush.bf16.msra.mxu2 %v1006_v41  ;;  %801 = vmatpush.bf16.msra.mxu0 %v1006_v41 }
  0x4f   :  { %422 = vrot.lane.b32.xlu1 %v390_v34, %s1125_s17  ;;  %v527_v34 = vsel %vm486_vm5, %v1413_v18, %v1531_v30  ;;  %v502_v37 = vsel %vm486_vm5, %v1368_v59, %v1535_v21  ;;  %v152_v18 = vor.u32 %v150_v39, %v1436_v53  ;;  %v1562_v58 = vrot.slane %v154_v48, 1 }
  0x50   :  { %v112_v59 = vor.u32 %v110_v32, %v1406_v49  ;;  %v189_v39 = vsel %vm182_vm0, %v186_v45, %v188_v62  ;;  %v261_v53 = vshrl.u32 %v1505_v50, 16  ;;  %v264_v32 = vshll.u32 %v1505_v50, 16  ;;  %v38_v49 = vld [vmem:[%s1946_s0 + $0x48] sm:$0x1]  ;;  %v1004_v45 = vld [vmem:[%s1947_s1] sm:$0xff] }
  0x51   :  { %998 = vmatmul.msk.bf16.gmra.mxu1 %vm557_vm7, %v1159_v2  ;;  %v157_v43 = vsel %vm89_vm2, %v152_v18, %v1562_v58  ;;  %v372_v15 = vunpack.c.l.b16 %v38_v49 }
  0x52   :  { %v263_v13 = vrot.slane %v261_v53, 1  ;;  %v266_v55 = vrot.slane %v264_v32, 2  ;;  %1106 = vmatpush.bf16.msra.mxu2 %v1005_v26  ;;  %802 = vmatpush.bf16.msra.mxu0 %v1005_v26  ;;  %v392_v48 = vrot.slane %v264_v32, 3  ;;  %v42_v26 = vld [vmem:[%s1946_s0 + $0x4c] sm:$0x3] }
  0x54   :  { %v1603_v63 = vor.u32 %v266_v55, %v263_v13  ;;  %v1634_v55 = vunpack.c.l.b16 %v42_v26 }
  0x55   :  { %467 = vrot.lane.b32.xlu0 %v452_v17, %s1123_s7  ;;  %365 = vrot.lane.b32.xlu2 %v350_v56, %s1120_s23  ;;  %v1573_v17 = vunpack.c.h.b16 %v1475_v36  ;;  %v198_v56 = vrot.slane %v1533_v42, 1 }
  0x56   :  { %1107 = vmatpush.bf16.msra.mxu2 %v1004_v45  ;;  %803 = vmatpush.bf16.msra.mxu0 %v1004_v45 }
  0x57   :  { %432 = vrot.lane.b32.xlu1 %v410_v47, %s1125_s17  ;;  %v117_v47 = vsel %vm89_vm2, %v112_v59, %v1567_v33  ;;  %v1598_v11 = vpack.c.b16 %v1573_v17, %v1573_v17  ;;  %v199_v41 = vsel %vm182_vm0, %v196_v52, %v198_v56  ;;  %v373_v18 = vpack.c.b16 %v372_v15, %v1573_v17  ;;  %v40_v59 = vld [vmem:[%s1946_s0 + $0x48] sm:$0xf] }
  0x58   :  { %v268_v52 = vsel %vm233_vm3, %v1426_v24, %v1603_v63  ;;  %v1632_v13 = vunpack.c.l.b16 %v40_v59 }
  0x59   :  { %v306_v23 = vshrl.u32 %v1598_v11, 16  ;;  %v351_v20 = vrot.slane %v1598_v11, 2 }
  0x5d   :  { %477 = vrot.lane.b32.xlu0 %v462_v25, %s1123_s7  ;;  %539 = vrot.lane.b32.xlu2 %v502_v37, %s1124_s16  ;;  %v309_v25 = vshll.u32 %v1598_v11, 16 }
  0x5f   :  { %549 = vrot.lane.b32.xlu1 %v527_v34, %s1124_s16  ;;  %v391_v34 = vrot.slane %v261_v53, 2  ;;  %v308_v53 = vrot.slane %v306_v23, 1  ;;  %v311_v32 = vrot.slane %v309_v25, 2  ;;  %v485_v25 = vpack.c.b16 %v1634_v55, %v1632_v13 }
  0x61   :  { %v1630_v49 = vor.u32 %v392_v48, %v391_v34  ;;  %999 = vmatmul.msk.bf16.gmra.mxu1 %vm557_vm7, %v1166_v5  ;;  %v352_v34 = vsel %vm335_vm1, %v349_v57, %v351_v20  ;;  %v503_v48 = vrot.slane %v126_v7, 3  ;;  %v41_v5 = vld [vmem:[%s1946_s0 + $0x4c] sm:$0x1]  ;;  %v529_v9 = vshrl.u32 %v485_v25, 16 }
  0x62   :  { %v532_v57 = vshll.u32 %v485_v25, 16  ;;  %v453_v7 = vrot.slane %v1149_v0, 3 }
  0x63   :  { %v394_v45 = vsel %vm374_vm6, %v1458_v38, %v1630_v49  ;;  %v504_v38 = vrot.slane %v122_v6, 4 }
  0x64   :  { %v456_v2 = vsel %vm447_vm4, %v453_v7, %v455_v44 }
  0x65   :  { %204 = vrot.lane.b32.xlu0 %v189_v39, %s1119_s22  ;;  %165 = vrot.lane.b32.xlu2 %v117_v47, %s1121_s5  ;;  %v342_v39 = vsel %vm335_vm1, %v339_v60, %v341_v4  ;;  %v415_v47 = vshll.u32 %v373_v18, 16  ;;  %v1639_v60 = vor.u32 %v311_v32, %v308_v53  ;;  %v1668_v6 = vor.u32 %v504_v38, %v503_v48 }
  0x66   :  { %v531_v53 = vrot.slane %v529_v9, 3  ;;  %v534_v32 = vrot.slane %v532_v57, 4 }
  0x67   :  { %175 = vrot.lane.b32.xlu1 %v157_v43, %s1121_s5  ;;  %v1607_v37 = vpop.permute.xlu2 %473  ;;  %v412_v43 = vshrl.u32 %v373_v18, 16  ;;  %v417_v23 = vrot.slane %v415_v47, 3  ;;  %v454_v47 = vsel %vm447_vm4, %v451_v10, %v453_v7  ;;  %v120_v10 = vor.u32 %v118_v54, %v1567_v33 }
  0x68   :  { %v510_v11 = vsel %vm486_vm5, %v1668_v6, %v1245_v46 }
  0x69   :  { %v414_v15 = vrot.slane %v412_v43, 2  ;;  %v506_v43 = vsel %vm486_vm5, %v1535_v21, %v1668_v6  ;;  %v125_v54 = vsel %vm89_vm2, %v120_v10, %v1182_v14 }
  0x6b   :  { %v1664_v18 = vor.u32 %v417_v23, %v414_v15  ;;  %v1686_v15 = vor.u32 %v534_v32, %v531_v53 }
  0x6d   :  { %214 = vrot.lane.b32.xlu0 %v199_v41, %s1119_s22  ;;  %318 = vrot.lane.b32.xlu2 %v268_v52, %s1122_s6  ;;  %v313_v41 = vsel %vm233_vm3, %v1451_v35, %v1639_v60  ;;  %v443_v35 = vunpack.c.l.b16 %v41_v5  ;;  %v419_v52 = vsel %vm374_vm6, %v1488_v12, %v1664_v18 }
  0x6f   :  { %357 = vrot.lane.b32.xlu1 %v342_v39, %s1120_s23  ;;  %v429_v24 = vpop.permute.xlu2 %428 }
  0x71   :  { %1000 = vmatmul.msk.bf16.gmra.mxu1 %vm557_vm7, %v1282_v19 }
  0x75   :  { %424 = vrot.lane.b32.xlu0 %v394_v45, %s1125_s17  ;;  %328 = vrot.lane.b32.xlu2 %v313_v41, %s1122_s6  ;;  %v1683_v45 = vpack.c.b16 %v443_v35, %v1632_v13  ;;  %v536_v41 = vsel %vm486_vm5, %v1531_v30, %v1686_v15  ;;  %v158_v30 = vshrl.u32 %v1533_v42, 16  ;;  %v191_v35 = vsel %vm182_vm0, %v188_v62, %v190_v3 }
  0x77   :  { %v209_v59 = vpop.permute.xlu0 %208  ;;  %367 = vrot.lane.b32.xlu1 %v352_v34, %s1120_s23  ;;  %v1671_v39 = vpop.permute.xlu2 %200  ;;  %v463_v21 = vrot.slane %v1683_v45, 3  ;;  %v160_v36 = vor.u32 %v158_v30, %v1562_v58 }
  0x79   :  { %v362_v26 = vpop.permute.xlu1 %361  ;;  %v464_v9 = vsel %vm447_vm4, %v461_v27, %v463_v21 }
  0x7d   :  { %434 = vrot.lane.b32.xlu0 %v419_v52, %s1125_s17  ;;  %469 = vrot.lane.b32.xlu2 %v454_v47, %s1123_s7 }
  0x7f   :  { %v170_v23 = vpop.permute.xlu0 %169  ;;  %541 = vrot.lane.b32.xlu1 %v506_v43, %s1124_s16  ;;  %v211_v48 = vpop.permute.xlu2 %210 }
  0x80   :  { %v567_v12 = vsel %vm557_vm7, %v1149_v0, %v170_v23 }
  0x81   :  { %v323_v25 = vpop.permute.xlu1 %322  ;;  %v587_v34 = vsel %vm577_vm8, %v567_v12, %v209_v59  ;;  %v277_v59 = vsel %vm233_vm3, %v1603_v63, %v1211_v29  ;;  %v344_v29 = vsel %vm335_vm1, %v341_v4, %v343_v8  ;;  %v398_v8 = vsel %vm374_vm6, %v1630_v49, %v1268_v61 }
  0x82   :  { %v606_v38 = vsel %vm596_vm9, %v587_v34, %v323_v25 }
  0x83   :  { %v625_v5 = vsel %vm615_vm10, %v606_v38, %v362_v26 }
  0x84   :  { %v644_v33 = vsel %vm634_vm11, %v625_v5, %v429_v24 }
  0x85   :  { %551 = vrot.lane.b32.xlu0 %v536_v41, %s1124_s16  ;;  %v663_v19 = vsel %vm653_vm12, %v644_v33, %v1607_v37  ;;  %479 = vrot.lane.b32.xlu2 %v464_v9, %s1123_s7 }
  0x87   :  { %v546_v57 = vpop.permute.xlu0 %545  ;;  %167 = vrot.lane.b32.xlu1 %v125_v54, %s1121_s5  ;;  %v421_v27 = vpop.permute.xlu2 %420 }
  0x88   :  { %v686_v14 = vsel %vm672_vm13, %v663_v19, %v546_v57 }
  0x89   :  { %824 = vmatmul.bf16.vlgmr.msra.gmra.mxu2 %v686_v14  ;;  %v162_v24 = vpop.permute.xlu1 %161 }
  0x8a   :  { %v559_v50 = vsel %vm557_vm7, %v1209_v28, %v162_v24 }
  0x8b   :  { %v579_v44 = vsel %vm577_vm8, %v559_v50, %v1671_v39 }
  0x8d   :  { %177 = vrot.lane.b32.xlu0 %v160_v36, %s1121_s5  ;;  %206 = vrot.lane.b32.xlu2 %v191_v35, %s1119_s22 }
  0x8f   :  { %v172_v37 = vpop.permute.xlu0 %171  ;;  %320 = vrot.lane.b32.xlu1 %v277_v59, %s1122_s6  ;;  %v431_v58 = vpop.permute.xlu2 %430 }
  0x90   :  { %v569_v42 = vsel %vm557_vm7, %v1154_v1, %v172_v37 }
  0x91   :  { %v315_v26 = vpop.permute.xlu1 %314  ;;  %v589_v49 = vsel %vm577_vm8, %v569_v42, %v211_v48 }
  0x92   :  { %v598_v63 = vsel %vm596_vm9, %v579_v44, %v315_v26 }
  0x95   :  { %359 = vrot.lane.b32.xlu0 %v344_v29, %s1120_s23  ;;  %216 = vrot.lane.b32.xlu2 %v198_v56, %s1119_s22 }
  0x97   :  { %v354_v0 = vpop.permute.xlu0 %353  ;;  %330 = vrot.lane.b32.xlu1 %v1639_v60, %s1122_s6  ;;  %v548_v62 = vpop.permute.xlu2 %547 }
  0x98   :  { %v617_v28 = vsel %vm615_vm10, %v598_v63, %v354_v0 }
  0x99   :  { %v325_v3 = vpop.permute.xlu1 %324  ;;  %v636_v1 = vsel %vm634_vm11, %v617_v28, %v421_v27 }
  0x9d   :  { %369 = vrot.lane.b32.xlu0 %v351_v20, %s1120_s23  ;;  %426 = vrot.lane.b32.xlu2 %v398_v8, %s1125_s17  ;;  %v608_v20 = vsel %vm596_vm9, %v589_v49, %v325_v3 }
  0x9f   :  { %v364_v4 = vpop.permute.xlu0 %363  ;;  %471 = vrot.lane.b32.xlu1 %v456_v2, %s1123_s7  ;;  %v174_v61 = vpop.permute.xlu2 %173  ;;  %v555_v2 = vpack.c.b16 %v1632_v13, %v1573_v17 }
  0xa0   :  { %v627_v60 = vsel %vm615_vm10, %v608_v20, %v364_v4  ;;  %v571_v57 = vsel %vm557_vm7, %v1188_v16, %v174_v61 }
  0xa1   :  { %v466_v56 = vpop.permute.xlu1 %465  ;;  %v646_v6 = vsel %vm634_vm11, %v627_v60, %v431_v58  ;;  %1002 = vmatmul.msk.bf16.gmra.mxu3 %vm557_vm7, %v555_v2 }
  0xa2   :  { %v655_v7 = vsel %vm653_vm12, %v636_v1, %v466_v56 }
  0xa5   :  { %543 = vrot.lane.b32.xlu0 %v510_v11, %s1124_s16  ;;  %436 = vrot.lane.b32.xlu2 %v1664_v18, %s1125_s17 }
  0xa7   :  { %v538_v39 = vpop.permute.xlu0 %537  ;;  %481 = vrot.lane.b32.xlu1 %v463_v21, %s1123_s7  ;;  %v356_v53 = vpop.permute.xlu2 %355 }
  0xa8   :  { %v674_v46 = vsel %vm672_vm13, %v655_v7, %v538_v39  ;;  %v1777_v21 = vpop.f32.mrf.mxu1 }
  0xa9   :  { %804 = vmatmul.bf16.vlgmr.msra.gmra.mxu0 %v674_v46  ;;  %v476_v52 = vpop.permute.xlu1 %475 }
  0xaa   :  { %v665_v32 = vsel %vm653_vm12, %v646_v6, %v476_v52 }
  0xab   :  { %v689_v43 = vsel %vm672_vm13, %v665_v32, %v548_v62 }
  0xac   :  { %829 = vmatmul.bf16.gmra.mxu2 %v689_v43 }
  0xad   :  { %553 = vrot.lane.b32.xlu2 %v1686_v15, %s1124_s16 }
  0xaf   :  { %v164_v47 = vpop.permute.xlu0 %163  ;;  %v366_v23 = vpop.permute.xlu2 %365 }
  0xb0   :  { %v561_v25 = vsel %vm557_vm7, %v1218_v31, %v164_v47  ;;  %v1783_v54 = vpop.f32.mrf.mxu1 }
  0xb1   :  { %v203_v45 = vpop.permute.xlu1 %202 }
  0xb2   :  { %v581_v41 = vsel %vm577_vm8, %v561_v25, %v203_v45 }
  0xb7   :  { %v317_v12 = vpop.permute.xlu0 %316  ;;  %v540_v10 = vpop.permute.xlu2 %539 }
  0xb8   :  { %v600_v5 = vsel %vm596_vm9, %v581_v41, %v317_v12  ;;  %v1794_v59 = vpop.f32.mrf.mxu1 }
  0xb9   :  { %v213_v18 = vpop.permute.xlu1 %212  ;;  %v619_v15 = vsel %vm615_vm10, %v600_v5, %v356_v53  ;;  %v556_v53 = vpack.c.b16 %v1634_v55, %v1634_v55  ;;  %v31_v55 = vld [vmem:[%s1946_s0 + $0x40] sm:$0x3] }
  0xba   :  { %v591_v24 = vsel %vm577_vm8, %v571_v57, %v213_v18  ;;  %v1837_v5 = vld [vmem:[%s1948_s2] ss:$0 sm:$0xff] }
  0xbb   :  { %1003 = vmatmul.msk.bf16.gmra.mxu3 %vm557_vm7, %v556_v53 }
  0xbf   :  { %v327_v34 = vpop.permute.xlu0 %326  ;;  %v166_v38 = vpop.permute.xlu2 %165 }
  0xc0   :  { %v610_v36 = vsel %vm596_vm9, %v591_v24, %v327_v34  ;;  %v1799_v3 = vpop.f32.mrf.mxu1  ;;  %v563_v61 = vsel %vm557_vm7, %v1234_v40, %v166_v38  ;;  %v76_v38 = vunpack.c.l.b16 %v31_v55 }
  0xc1   :  { %v423_v48 = vpop.permute.xlu1 %422  ;;  %v629_v27 = vsel %vm615_vm10, %v610_v36, %v366_v23 }
  0xc2   :  { %v638_v33 = vsel %vm634_vm11, %v619_v15, %v423_v48 }
  0xc7   :  { %v468_v9 = vpop.permute.xlu0 %467  ;;  %v319_v14 = vpop.permute.xlu2 %318 }
  0xc8   :  { %v657_v30 = vsel %vm653_vm12, %v638_v33, %v468_v9  ;;  %v1804_v42 = vpop.f32.mrf.mxu1  ;;  %v85_v9 = vpack.c.b16 %v76_v38, %v76_v38 }
  0xc9   :  { %v433_v31 = vpop.permute.xlu1 %432  ;;  %v677_v19 = vsel %vm672_vm13, %v657_v30, %v540_v10 }
  0xca   :  { %809 = vmatmul.bf16.gmra.mxu0 %v677_v19  ;;  %v648_v35 = vsel %vm634_vm11, %v629_v27, %v433_v31 }
  0xcf   :  { %v478_v37 = vpop.permute.xlu0 %477  ;;  %v329_v29 = vpop.permute.xlu2 %328 }
  0xd0   :  { %v667_v26 = vsel %vm653_vm12, %v648_v35, %v478_v37  ;;  %v1810_v49 = vpop.f32.mrf.mxu1 }
  0xd1   :  { %v550_v58 = vpop.permute.xlu1 %549 }
  0xd2   :  { %v692_v16 = vsel %vm672_vm13, %v667_v26, %v550_v58 }
  0xd3   :  { %834 = vmatmul.bf16.gmra.mxu2 %v692_v16 }
  0xd7   :  { %v205_v0 = vpop.permute.xlu0 %204  ;;  %v470_v8 = vpop.permute.xlu2 %469 }
  0xd8   :  { %v583_v63 = vsel %vm577_vm8, %v563_v61, %v205_v0  ;;  %v1825_v32 = vpop.f32.mrf.mxu1 }
  0xd9   :  { %v176_v62 = vpop.permute.xlu1 %175  ;;  %v602_v28 = vsel %vm596_vm9, %v583_v63, %v319_v14 }
  0xda   :  { %v573_v13 = vsel %vm557_vm7, %v1360_v51, %v176_v62 }
  0xdf   :  { %v215_v50 = vpop.permute.xlu0 %214  ;;  %v480_v44 = vpop.permute.xlu2 %479 }
  0xe0   :  { %v593_v1 = vsel %vm577_vm8, %v573_v13, %v215_v50  ;;  %v1829_v10 = vpop.f32.mrf.mxu1 }
  0xe1   :  { %v358_v4 = vpop.permute.xlu1 %357  ;;  %v612_v46 = vsel %vm596_vm9, %v593_v1, %v329_v29 }
  0xe2   :  { %v621_v17 = vsel %vm615_vm10, %v602_v28, %v358_v4 }
  0xe7   :  { %v425_v56 = vpop.permute.xlu0 %424  ;;  %v207_v7 = vpop.permute.xlu2 %206 }
  0xe8   :  { %v640_v20 = vsel %vm634_vm11, %v621_v17, %v425_v56  ;;  %v878_v15 = vpop.f32.mrf.mxu1 }
  0xe9   :  { %v368_v11 = vpop.permute.xlu1 %367  ;;  %v659_v40 = vsel %vm653_vm12, %v640_v20, %v470_v8 }
  0xea   :  { %v631_v52 = vsel %vm615_vm10, %v612_v46, %v368_v11 }
  0xef   :  { %v435_v60 = vpop.permute.xlu0 %434  ;;  %v217_v12 = vpop.permute.xlu2 %216 }
  0xf0   :  { %v650_v51 = vsel %vm634_vm11, %v631_v52, %v435_v60  ;;  %v880_v0 = vpop.f32.mrf.mxu1 }
  0xf1   :  { %v542_v39 = vpop.permute.xlu1 %541  ;;  %v669_v43 = vsel %vm653_vm12, %v650_v51, %v480_v44 }
  0xf2   :  { %v680_v6 = vsel %vm672_vm13, %v659_v40, %v542_v39 }
  0xf3   :  { %814 = vmatmul.bf16.gmra.mxu0 %v680_v6 }
  0xf7   :  { %v552_v47 = vpop.permute.xlu0 %551  ;;  %v427_v34 = vpop.permute.xlu2 %426 }
  0xf8   :  { %v695_v45 = vsel %vm672_vm13, %v669_v43, %v552_v47  ;;  %v883_v46 = vpop.f32.mrf.mxu1 }
  0xf9   :  { %839 = vmatmul.bf16.gmra.mxu2 %v695_v45  ;;  %v168_v23 = vpop.permute.xlu1 %167 }
  0xfa   :  { %v565_v57 = vsel %vm557_vm7, %v1467_v22, %v168_v23 }
  0xfb   :  { %v585_v36 = vsel %vm577_vm8, %v565_v57, %v207_v7 }
  0xff   :  { %v178_v18 = vpop.permute.xlu0 %177  ;;  %v437_v31 = vpop.permute.xlu2 %436 }
 0x100   :  { %v576_v24 = vsel %vm557_vm7, %v85_v9, %v178_v18 }
 0x101   :  { %v321_v25 = vpop.permute.xlu1 %320  ;;  %v595_v16 = vsel %vm577_vm8, %v576_v24, %v217_v12 }
 0x102   :  { %v604_v37 = vsel %vm596_vm9, %v585_v36, %v321_v25  ;;  %v885_v25 = vpop.f32.mrf.mxu1 }
 0x107   :  { %v360_v48 = vpop.permute.xlu0 %359  ;;  %v554_v61 = vpop.permute.xlu2 %553 }
 0x108   :  { %v623_v26 = vsel %vm615_vm10, %v604_v37, %v360_v48 }
 0x109   :  { %v331_v41 = vpop.permute.xlu1 %330  ;;  %v642_v2 = vsel %vm634_vm11, %v623_v26, %v427_v34 }
 0x10a   :  { %v614_v22 = vsel %vm596_vm9, %v595_v16, %v331_v41 }
 0x10c   :  { %v825_v33 = vpop.f32.mrf.mxu2 }
 0x10d   :  { %v826_v30 = vadd.f32 %v1837_v5, %v825_v33 }
 0x10f   :  { %v879_v19 = vadd.f32 %v878_v15, %v826_v30  ;;  %v370_v14 = vpop.permute.xlu0 %369 }
 0x110   :  { %v633_v8 = vsel %vm615_vm10, %v614_v22, %v370_v14  ;;  %v888_v14 = vpop.f32.mrf.mxu3 }
 0x111   :  { %v910_v27 = vmax.f32 %v879_v19, 0.0  ;;  %v472_v35 = vpop.permute.xlu1 %471  ;;  %v652_v63 = vsel %vm634_vm11, %v633_v8, %v437_v31 }
 0x112   :  { %v661_v50 = vsel %vm653_vm12, %v642_v2, %v472_v35 }
 0x113   :  { %v927_v58 = vpack.c.bf16 %v910_v27, %v910_v27 }
 0x114   :  { %v827_v29 = vpop.f32.mrf.mxu2 }
 0x115   :  { %945 = vst.msk [vmem:[%s1949_s3 + $0x20] sm:$0xf] %vm936_vm14, %v927_v58  ;;  %v828_v62 = vadd.f32 %v1837_v5, %v827_v29 }
 0x117   :  { %v881_v4 = vadd.f32 %v880_v0, %v828_v62  ;;  %v544_v44 = vpop.permute.xlu0 %543 }
 0x118   :  { %v683_v56 = vsel %vm672_vm13, %v661_v50, %v544_v44  ;;  %v890_v58 = vpop.f32.mrf.mxu3 }
 0x119   :  { %v911_v11 = vmax.f32 %v881_v4, 0.0  ;;  %819 = vmatmul.bf16.gmra.mxu0 %v683_v56  ;;  %v482_v28 = vpop.permute.xlu1 %481 }
 0x11a   :  { %v671_v17 = vsel %vm653_vm12, %v652_v63, %v482_v28 }
 0x11b   :  { %v928_v13 = vpack.c.bf16 %v911_v11, %v911_v11  ;;  %v698_v20 = vsel %vm672_vm13, %v671_v17, %v554_v61 }
 0x11c   :  { %844 = vmatmul.bf16.gmra.mxu2 %v698_v20 }
 0x11d   :  { %946 = vst.msk [vmem:[%s1949_s3 + $0x24] sm:$0xf] %vm936_vm14, %v928_v13 }
 0x124   :  { %v893_v22 = vpop.f32.mrf.mxu3 }
 0x126   :  { %v805_v1 = vpop.f32.mrf.mxu0 }
 0x127   :  { %v806_v60 = vadd.f32 %v1837_v5, %v805_v1 }
 0x129   :  { %v859_v7 = vadd.f32 %v1777_v21, %v806_v60 }
 0x12b   :  { %v902_v40 = vmax.f32 %v859_v7, 0.0 }
 0x12c   :  { %v895_v2 = vpop.f32.mrf.mxu3 }
 0x12d   :  { %v919_v39 = vpack.c.bf16 %v902_v40, %v902_v40 }
 0x12e   :  { %v807_v6 = vpop.f32.mrf.mxu0 }
 0x12f   :  { %937 = vst.msk [vmem:[%s1949_s3] sm:$0xf] %vm936_vm14, %v919_v39  ;;  %v808_v52 = vadd.f32 %v1837_v5, %v807_v6  ;;  %v830_v53 = vpop.f32.mrf.mxu2 }
 0x130   :  { %v831_v51 = vadd.f32 %v1837_v5, %v830_v53 }
 0x131   :  { %v861_v43 = vadd.f32 %v1783_v54, %v808_v52 }
 0x132   :  { %v884_v47 = vadd.f32 %v883_v46, %v831_v51 }
 0x133   :  { %v903_v45 = vmax.f32 %v861_v43, 0.0 }
 0x134   :  { %v912_v23 = vmax.f32 %v884_v47, 0.0 }
 0x135   :  { %v920_v21 = vpack.c.bf16 %v903_v45, %v903_v45 }
 0x136   :  { %v929_v12 = vpack.c.bf16 %v912_v23, %v912_v23 }
 0x137   :  { %938 = vst.msk [vmem:[%s1949_s3 + $0x4] sm:$0xf] %vm936_vm14, %v920_v21  ;;  %v832_v18 = vpop.f32.mrf.mxu2 }
 0x138   :  { %947 = vst.msk [vmem:[%s1949_s3 + $0x28] sm:$0xf] %vm936_vm14, %v929_v12  ;;  %v833_v34 = vadd.f32 %v1837_v5, %v832_v18 }
 0x13a   :  { %v886_v54 = vadd.f32 %v885_v25, %v833_v34 }
 0x13c   :  { %v913_v55 = vmax.f32 %v886_v54, 0.0 }
 0x13e   :  { %v930_v48 = vpack.c.bf16 %v913_v55, %v913_v55  ;;  %v898_v61 = vpop.f32.mrf.mxu3 }
 0x140   :  { %948 = vst.msk [vmem:[%s1949_s3 + $0x2c] sm:$0xf] %vm936_vm14, %v930_v48 }
 0x147   :  { %v810_v38 = vpop.f32.mrf.mxu0 }
 0x148   :  { %v811_v41 = vadd.f32 %v1837_v5, %v810_v38 }
 0x14a   :  { %v864_v15 = vadd.f32 %v1794_v59, %v811_v41 }
 0x14c   :  { %v904_v33 = vmax.f32 %v864_v15, 0.0 }
 0x14e   :  { %v921_v9 = vpack.c.bf16 %v904_v33, %v904_v33 }
 0x14f   :  { %v812_v30 = vpop.f32.mrf.mxu0 }
 0x150   :  { %939 = vst.msk [vmem:[%s1949_s3 + $0x8] sm:$0xf] %vm936_vm14, %v921_v9  ;;  %v813_v57 = vadd.f32 %v1837_v5, %v812_v30 }
 0x152   :  { %v866_v31 = vadd.f32 %v1799_v3, %v813_v57 }
 0x154   :  { %v905_v19 = vmax.f32 %v866_v31, 0.0 }
 0x156   :  { %v922_v24 = vpack.c.bf16 %v905_v19, %v905_v19  ;;  %v835_v36 = vpop.f32.mrf.mxu2 }
 0x157   :  { %v836_v27 = vadd.f32 %v1837_v5, %v835_v36 }
 0x158   :  { %940 = vst.msk [vmem:[%s1949_s3 + $0xc] sm:$0xf] %vm936_vm14, %v922_v24 }
 0x159   :  { %v889_v59 = vadd.f32 %v888_v14, %v836_v27 }
 0x15b   :  { %v914_v35 = vmax.f32 %v889_v59, 0.0 }
 0x15d   :  { %v931_v37 = vpack.c.bf16 %v914_v35, %v914_v35 }
 0x15e   :  { %v837_v26 = vpop.f32.mrf.mxu2 }
 0x15f   :  { %949 = vst.msk [vmem:[%s1949_s3 + $0x30] sm:$0xf] %vm936_vm14, %v931_v37  ;;  %v838_v3 = vadd.f32 %v1837_v5, %v837_v26 }
 0x161   :  { %v891_v16 = vadd.f32 %v890_v58, %v838_v3 }
 0x163   :  { %v915_v29 = vmax.f32 %v891_v16, 0.0 }
 0x165   :  { %v932_v0 = vpack.c.bf16 %v915_v29, %v915_v29 }
 0x167   :  { %950 = vst.msk [vmem:[%s1949_s3 + $0x34] sm:$0xf] %vm936_vm14, %v932_v0 }
 0x170   :  { %v815_v62 = vpop.f32.mrf.mxu0 }
 0x171   :  { %v816_v8 = vadd.f32 %v1837_v5, %v815_v62 }
 0x173   :  { %v869_v50 = vadd.f32 %v1804_v42, %v816_v8  ;;  %v900_v42 = vpop.f32.mrf.mxu3 }
 0x175   :  { %v906_v4 = vmax.f32 %v869_v50, 0.0 }
 0x177   :  { %v923_v44 = vpack.c.bf16 %v906_v4, %v906_v4 }
 0x178   :  { %v817_v56 = vpop.f32.mrf.mxu0 }
 0x179   :  { %941 = vst.msk [vmem:[%s1949_s3 + $0x10] sm:$0xf] %vm936_vm14, %v923_v44  ;;  %v818_v63 = vadd.f32 %v1837_v5, %v817_v56 }
 0x17b   :  { %v871_v11 = vadd.f32 %v1810_v49, %v818_v63 }
 0x17c   :  { %v840_v28 = vpop.f32.mrf.mxu2 }
 0x17d   :  { %v907_v17 = vmax.f32 %v871_v11, 0.0  ;;  %v841_v13 = vadd.f32 %v1837_v5, %v840_v28 }
 0x17f   :  { %v924_v20 = vpack.c.bf16 %v907_v17, %v907_v17  ;;  %v894_v1 = vadd.f32 %v893_v22, %v841_v13 }
 0x181   :  { %942 = vst.msk [vmem:[%s1949_s3 + $0x14] sm:$0xf] %vm936_vm14, %v924_v20  ;;  %v916_v60 = vmax.f32 %v894_v1, 0.0 }
 0x183   :  { %v933_v7 = vpack.c.bf16 %v916_v60, %v916_v60 }
 0x184   :  { %v842_v40 = vpop.f32.mrf.mxu2 }
 0x185   :  { %951 = vst.msk [vmem:[%s1949_s3 + $0x38] sm:$0xf] %vm936_vm14, %v933_v7  ;;  %v843_v49 = vadd.f32 %v1837_v5, %v842_v40 }
 0x187   :  { %v896_v39 = vadd.f32 %v895_v2, %v843_v49 }
 0x189   :  { %v917_v46 = vmax.f32 %v896_v39, 0.0 }
 0x18b   :  { %v934_v6 = vpack.c.bf16 %v917_v46, %v917_v46 }
 0x18d   :  { %952 = vst.msk [vmem:[%s1949_s3 + $0x3c] sm:$0xf] %vm936_vm14, %v934_v6 }
 0x196   :  { %v820_v52 = vpop.f32.mrf.mxu0 }
 0x197   :  { %v821_v53 = vadd.f32 %v1837_v5, %v820_v52 }
 0x199   :  { %v874_v51 = vadd.f32 %v1825_v32, %v821_v53 }
 0x19b   :  { %v908_v43 = vmax.f32 %v874_v51, 0.0 }
 0x19d   :  { %v925_v47 = vpack.c.bf16 %v908_v43, %v908_v43 }
 0x19e   :  { %v822_v45 = vpop.f32.mrf.mxu0 }
 0x19f   :  { %943 = vst.msk [vmem:[%s1949_s3 + $0x18] sm:$0xf] %vm936_vm14, %v925_v47  ;;  %v823_v23 = vadd.f32 %v1837_v5, %v822_v45  ;;  %v845_v21 = vpop.f32.mrf.mxu2 }
 0x1a0   :  { %v846_v12 = vadd.f32 %v1837_v5, %v845_v21 }
 0x1a1   :  { %v876_v18 = vadd.f32 %v1829_v10, %v823_v23 }
 0x1a2   :  { %v899_v25 = vadd.f32 %v898_v61, %v846_v12 }
 0x1a3   :  { %v909_v34 = vmax.f32 %v876_v18, 0.0 }
 0x1a4   :  { %v918_v54 = vmax.f32 %v899_v25, 0.0 }
 0x1a5   :  { %v926_v55 = vpack.c.bf16 %v909_v34, %v909_v34 }
 0x1a6   :  { %v935_v32 = vpack.c.bf16 %v918_v54, %v918_v54 }
 0x1a7   :  { %944 = vst.msk [vmem:[%s1949_s3 + $0x1c] sm:$0xf] %vm936_vm14, %v926_v55  ;;  %v847_v48 = vpop.f32.mrf.mxu2 }
 0x1a8   :  { %954 = vst.msk [vmem:[%s1949_s3 + $0x40] sm:$0x3] %vm953_vm15, %v935_v32 }

</bundles_post_ra>
